<compile_context>
chip_gen: v6e
topology: v6e:2x2x1
jax: 0.10.0
libtpu: 0.0.40
codegen_flags: <defaults>
</compile_context>

<pallas_src>
import functools

import jax
import jax.numpy as jnp
from jax.experimental import pallas as pl
from jax.experimental.pallas import tpu as pltpu

BN_EPS = 1e-5          # PyTorch BatchNorm1d default eps
PRELU_ALPHA = 0.25     # PyTorch nn.PReLU default (single shared slope)
_FUSED_VMEM_BYTES_MAX = 2 * 1024 * 1024   # keep the fused path well inside VMEM


def _apply_act(y, act, alpha):
    if act == "tanh":
        return jnp.tanh(y)
    return jnp.where(y >= 0, y, alpha * y)   # PReLU with shared slope


# ---------------------------------------------------------------------------
# Tiled per-layer kernel: y = act((x @ wt) * scale + shift)
# ---------------------------------------------------------------------------
def _make_layer_kernel(act, alpha):
    def kernel(x_ref, wt_ref, scale_ref, shift_ref, o_ref):
        k = pl.program_id(2)

        @pl.when(k == 0)
        def _():
            o_ref[...] = jnp.zeros_like(o_ref)

        # bf16 x bf16 on the MXU, f32 accumulation directly into the resident
        # output block (output index_map ignores k, so the block stays in VMEM
        # for the whole reduction; no separate scratch accumulator needed).
        o_ref[...] += jnp.dot(x_ref[...], wt_ref[...],
                              preferred_element_type=jnp.float32)

        @pl.when(k == pl.num_programs(2) - 1)
        def _():
            y = o_ref[...] * scale_ref[...] + shift_ref[...]
            o_ref[...] = _apply_act(y, act, alpha)

    return kernel


def _pick_tile(dim, candidates):
    """Largest candidate tile that evenly divides dim; full extent otherwise."""
    for c in candidates:
        if dim >= c and dim % c == 0:
            return c
    return dim


def mlp_layer(x, wt, scale, shift, *, act, alpha=PRELU_ALPHA):
    """One basic_dense_block (eval): act((x @ wt) * scale + shift).

    x:  (B, K) float (cast to bf16 at the pallas_call boundary)
    wt: (K, N) bf16, pre-transposed nn.Linear weight
    scale, shift: (N,) f32 folded BatchNorm affine
    """
    B, K = x.shape
    Kw, N = wt.shape
    assert Kw == K

    tb = _pick_tile(B, (256, 128))
    tn = _pick_tile(N, (512, 256, 128))       # lane-dense output tiles
    tk = _pick_tile(K, (512, 256, 128))
    grid = (B // tb, N // tn, K // tk)
    # TODO(synk): K/N not a multiple of 128 falls back to full-extent blocks;
    # very large ragged dims would need padding outside the kernel.

    return pl.pallas_call(
        _make_layer_kernel(act, alpha),
        out_shape=jax.ShapeDtypeStruct((B, N), jnp.float32),
        grid_spec=pltpu.PrefetchScalarGridSpec(
            num_scalar_prefetch=0,
            grid=grid,
            in_specs=[
                pl.BlockSpec((tb, tk), lambda b, n, k: (b, k)),   # x  (bf16)
                pl.BlockSpec((tk, tn), lambda b, n, k: (k, n)),   # w^T (bf16)
                pl.BlockSpec((1, tn), lambda b, n, k: (0, n)),    # BN scale
                pl.BlockSpec((1, tn), lambda b, n, k: (0, n)),    # BN shift
            ],
            out_specs=pl.BlockSpec((tb, tn), lambda b, n, k: (b, n)),
        ),
        compiler_params=pltpu.CompilerParams(
            dimension_semantics=("parallel", "parallel", "arbitrary")),
    )(x.astype(jnp.bfloat16), wt.astype(jnp.bfloat16),
      scale.reshape(1, N).astype(jnp.float32),
      shift.reshape(1, N).astype(jnp.float32))


# ---------------------------------------------------------------------------
# Fused whole-MLP kernel (all weights resident in VMEM)
# ---------------------------------------------------------------------------
def _make_fused_kernel(n_layers, acts, alpha):
    def kernel(*refs):
        x_ref, o_ref = refs[0], refs[-1]
        prm = refs[1:-1]                  # 3 refs per layer: (wt, scale, shift)
        h = x_ref[...]                    # bf16
        for i in range(n_layers):
            wt = prm[3 * i][...]
            scale = prm[3 * i + 1][...]
            shift = prm[3 * i + 2][...]
            y = jnp.dot(h, wt, preferred_element_type=jnp.float32)
            y = _apply_act(y * scale + shift, acts[i], alpha)
            h = y.astype(jnp.bfloat16) if i + 1 < n_layers else y
        o_ref[...] = h.astype(o_ref.dtype)
    return kernel


def mlp_fused(x, layers, acts, alpha=PRELU_ALPHA):
    """Whole MLP in a single pallas_call (one launch, no HBM intermediates)."""
    B, K0 = x.shape
    n_layers = len(layers)
    N_out = layers[-1]["wt"].shape[1]

    args = [x.astype(jnp.bfloat16)]
    in_specs = [pl.BlockSpec((B, K0), lambda i: (0, 0))]
    for lyr in layers:
        K, N = lyr["wt"].shape
        args += [lyr["wt"].astype(jnp.bfloat16),
                 lyr["scale"].reshape(1, N).astype(jnp.float32),
                 lyr["shift"].reshape(1, N).astype(jnp.float32)]
        in_specs += [pl.BlockSpec((K, N), lambda i: (0, 0)),
                     pl.BlockSpec((1, N), lambda i: (0, 0)),
                     pl.BlockSpec((1, N), lambda i: (0, 0))]

    return pl.pallas_call(
        _make_fused_kernel(n_layers, acts, alpha),
        out_shape=jax.ShapeDtypeStruct((B, N_out), jnp.float32),
        grid_spec=pltpu.PrefetchScalarGridSpec(
            num_scalar_prefetch=0,
            grid=(1,),
            in_specs=in_specs,
            out_specs=pl.BlockSpec((B, N_out), lambda i: (0, 0)),
        ),
        compiler_params=pltpu.CompilerParams(
            dimension_semantics=("arbitrary",)),
    )(*args)


# ---------------------------------------------------------------------------
# Parameters & forward
# ---------------------------------------------------------------------------
def init_params(c_dim_list, key):
    """nn.Linear-like init + BN running stats.

    Weights are stored pre-transposed (K, N) and pre-cast to bf16 once at init,
    so the forward pass never pays an extra transpose / cast of the full matrix.
    """
    params = []
    for c_in, c_out in zip(c_dim_list[:-1], c_dim_list[1:]):
        key, kw, kb, kg, kbeta, kmu, kvar = jax.random.split(key, 7)
        bound = 1.0 / jnp.sqrt(jnp.float32(c_in))
        w = jax.random.uniform(kw, (c_out, c_in), jnp.float32, -bound, bound)
        params.append(dict(
            wt=jnp.transpose(w).astype(jnp.bfloat16),            # (K, N) bf16
            b=jax.random.uniform(kb, (c_out,), jnp.float32, -bound, bound),
            gamma=1.0 + 0.1 * jax.random.normal(kg, (c_out,), jnp.float32),
            beta=0.1 * jax.random.normal(kbeta, (c_out,), jnp.float32),
            run_mean=0.05 * jax.random.normal(kmu, (c_out,), jnp.float32),
            run_var=1.0 + 0.1 * jax.random.uniform(kvar, (c_out,), jnp.float32),
        ))
    return params


def _fold_bn(p):
    # Keep the fold in f32 (scale/shift stay f32 in the kernel epilogue).
    scale = p["gamma"] * jax.lax.rsqrt(p["run_var"] + BN_EPS)
    shift = scale * (p["b"] - p["run_mean"]) + p["beta"]
    return dict(wt=p["wt"], scale=scale, shift=shift)


@functools.partial(jax.jit, static_argnames=("has_l2norm",))
def mlp_dropout_forward(x, params, has_l2norm=False):
    """MLP_dropout.forward (eval mode, dims=None)."""
    B = x.shape[0]
    h = x.reshape(B, -1).astype(jnp.float32)          # x.view(batch_size, -1)
    n_layers = len(params)
    acts = tuple("tanh" if i + 1 == n_layers else "prelu"
                 for i in range(n_layers))
    layers = [_fold_bn(p) for p in params]

    weight_bytes = sum(2 * l["wt"].size for l in layers)
    act_bytes = 4 * B * max([h.shape[1]] + [l["wt"].shape[1] for l in layers])
    if (not has_l2norm) and (weight_bytes + act_bytes) <= _FUSED_VMEM_BYTES_MAX:
        return mlp_fused(h, layers, acts)

    for i, l in enumerate(layers):
        h = mlp_layer(h, l["wt"], l["scale"], l["shift"], act=acts[i])
        if has_l2norm:
            h = h / jnp.maximum(jnp.linalg.norm(h, axis=1, keepdims=True), 1e-12)
    return h   # dims is None -> logits == h


def reference_forward(x, params, has_l2norm=False):
    """Pure-JAX f32 reference (same bf16-stored weights, full-precision math)."""
    B = x.shape[0]
    h = x.reshape(B, -1).astype(jnp.float32)
    n = len(params)
    for i, p in enumerate(params):
        z = h @ p["wt"].astype(jnp.float32) + p["b"]
        z = (p["gamma"] * (z - p["run_mean"])
             * jax.lax.rsqrt(p["run_var"] + BN_EPS) + p["beta"])
        h = jnp.tanh(z) if i + 1 == n else jnp.where(z >= 0, z, PRELU_ALPHA * z)
        if has_l2norm:
            h = h / jnp.maximum(jnp.linalg.norm(h, axis=1, keepdims=True), 1e-12)
    return h


if __name__ == "__main__":
    key = jax.random.PRNGKey(0)
    kx, kp, kx2, kp2 = jax.random.split(key, 4)

    # --- small case (fused single-kernel path): NCHW input, flatten -> MLP ---
    B, C, H, W = 2, 4, 16, 16
    x = jax.random.normal(kx, (B, C, H, W), jnp.float32)
    c_dim_list = [C * H * W, 32, 16]        # 1024->32 (prelu), 32->16 (tanh)
    params = init_params(c_dim_list, kp)

    out = jax.block_until_ready(mlp_dropout_forward(x, params))
    ref = reference_forward(x, params)
    assert out.shape == (B, c_dim_list[-1])
    assert bool(jnp.all(jnp.isfinite(out)))
    assert float(jnp.max(jnp.abs(out - ref))) < 0.1   # bf16-matmul tolerance

    # --- larger case exercising the tiled (B, N, K)-grid per-layer path ---
    B2 = 16
    x2 = jax.random.normal(kx2, (B2, 1024), jnp.float32)
    params2 = init_params([1024, 1024, 512], kp2)
    out2 = jax.block_until_ready(mlp_dropout_forward(x2, params2))
    ref2 = reference_forward(x2, params2)
    assert out2.shape == (B2, 512)
    assert bool(jnp.all(jnp.isfinite(out2)))
    assert float(jnp.max(jnp.abs(out2 - ref2))) < 0.1

    print("KERNEL_OK")
</pallas_src>

<mosaic_0001>
module attributes {stable_mosaic.version = 11 : i64} {
  func.func @kernel(%arg0: i32, %arg1: memref<2x1024xbf16, #tpu.memory_space<vmem>>, %arg2: memref<1024x32xbf16, #tpu.memory_space<vmem>>, %arg3: memref<1x32xf32, #tpu.memory_space<vmem>>, %arg4: memref<1x32xf32, #tpu.memory_space<vmem>>, %arg5: memref<32x16xbf16, #tpu.memory_space<vmem>>, %arg6: memref<1x16xf32, #tpu.memory_space<vmem>>, %arg7: memref<1x16xf32, #tpu.memory_space<vmem>>, %arg8: memref<2x16xf32, #tpu.memory_space<vmem>>) attributes {dimension_semantics = [#tpu.dimension_semantics<arbitrary>], iteration_bounds = array<i64: 1>, scalar_prefetch = 0 : i64, scratch_operands = 0 : i64, tpu.core_type = #tpu.core_type<tc>, window_params = [{pipeline_mode = #tpu.pipeline_mode<synchronous>, transform_indices = @transform_0, window_bounds = array<i64: 2, 1024>}, {pipeline_mode = #tpu.pipeline_mode<synchronous>, transform_indices = @transform_1, window_bounds = array<i64: 1024, 32>}, {pipeline_mode = #tpu.pipeline_mode<synchronous>, transform_indices = @transform_2, window_bounds = array<i64: 1, 32>}, {pipeline_mode = #tpu.pipeline_mode<synchronous>, transform_indices = @transform_3, window_bounds = array<i64: 1, 32>}, {pipeline_mode = #tpu.pipeline_mode<synchronous>, transform_indices = @transform_4, window_bounds = array<i64: 32, 16>}, {pipeline_mode = #tpu.pipeline_mode<synchronous>, transform_indices = @transform_5, window_bounds = array<i64: 1, 16>}, {pipeline_mode = #tpu.pipeline_mode<synchronous>, transform_indices = @transform_6, window_bounds = array<i64: 1, 16>}, {pipeline_mode = #tpu.pipeline_mode<synchronous>, transform_indices = @transform_7, window_bounds = array<i64: 2, 16>}]} {
    %c0 = arith.constant 0 : index
    %c0_0 = arith.constant 0 : index
    %0 = vector.load %arg1[%c0, %c0_0] : memref<2x1024xbf16, #tpu.memory_space<vmem>>, vector<2x1024xbf16>
    %c0_1 = arith.constant 0 : index
    %c0_2 = arith.constant 0 : index
    %1 = vector.load %arg2[%c0_1, %c0_2] : memref<1024x32xbf16, #tpu.memory_space<vmem>>, vector<1024x32xbf16>
    %c0_3 = arith.constant 0 : index
    %c0_4 = arith.constant 0 : index
    %2 = vector.load %arg3[%c0_3, %c0_4] : memref<1x32xf32, #tpu.memory_space<vmem>>, vector<1x32xf32>
    %c0_5 = arith.constant 0 : index
    %c0_6 = arith.constant 0 : index
    %3 = vector.load %arg4[%c0_5, %c0_6] : memref<1x32xf32, #tpu.memory_space<vmem>>, vector<1x32xf32>
    %cst = arith.constant dense<0.000000e+00> : vector<2x32xf32>
    %4 = tpu.matmul %0, %1, %cst {dimension_numbers = #tpu.dot_dimension_numbers<[1], [0], [0], [1], [0, 0, 1, 1], [], []>} : vector<2x1024xbf16>, vector<1024x32xbf16>, vector<2x32xf32> -> vector<2x32xf32>
    %5 = vector.broadcast %2 : vector<1x32xf32> to vector<2x32xf32>
    %6 = arith.mulf %4, %5 : vector<2x32xf32>
    %7 = vector.broadcast %3 : vector<1x32xf32> to vector<2x32xf32>
    %8 = arith.addf %6, %7 : vector<2x32xf32>
    %cst_7 = arith.constant 0.000000e+00 : f32
    %9 = vector.broadcast %cst_7 : f32 to vector<2x32xf32>
    %10 = arith.cmpf oge, %8, %9 : vector<2x32xf32>
    %cst_8 = arith.constant 2.500000e-01 : f32
    %11 = vector.broadcast %cst_8 : f32 to vector<2x32xf32>
    %12 = arith.mulf %11, %8 : vector<2x32xf32>
    %13 = arith.select %10, %8, %12 : vector<2x32xi1>, vector<2x32xf32>
    %14 = arith.truncf %13 : vector<2x32xf32> to vector<2x32xbf16>
    %c0_9 = arith.constant 0 : index
    %c0_10 = arith.constant 0 : index
    %15 = vector.load %arg5[%c0_9, %c0_10] : memref<32x16xbf16, #tpu.memory_space<vmem>>, vector<32x16xbf16>
    %c0_11 = arith.constant 0 : index
    %c0_12 = arith.constant 0 : index
    %16 = vector.load %arg6[%c0_11, %c0_12] : memref<1x16xf32, #tpu.memory_space<vmem>>, vector<1x16xf32>
    %c0_13 = arith.constant 0 : index
    %c0_14 = arith.constant 0 : index
    %17 = vector.load %arg7[%c0_13, %c0_14] : memref<1x16xf32, #tpu.memory_space<vmem>>, vector<1x16xf32>
    %cst_15 = arith.constant dense<0.000000e+00> : vector<2x16xf32>
    %18 = tpu.matmul %14, %15, %cst_15 {dimension_numbers = #tpu.dot_dimension_numbers<[1], [0], [0], [1], [0, 0, 1, 1], [], []>} : vector<2x32xbf16>, vector<32x16xbf16>, vector<2x16xf32> -> vector<2x16xf32>
    %19 = vector.broadcast %16 : vector<1x16xf32> to vector<2x16xf32>
    %20 = arith.mulf %18, %19 : vector<2x16xf32>
    %21 = vector.broadcast %17 : vector<1x16xf32> to vector<2x16xf32>
    %22 = arith.addf %20, %21 : vector<2x16xf32>
    %23 = math.tanh %22 : vector<2x16xf32>
    %c0_16 = arith.constant 0 : index
    %c0_17 = arith.constant 0 : index
    %24 = vector.load %arg8[%c0_16, %c0_17] : memref<2x16xf32, #tpu.memory_space<vmem>>, vector<2x16xf32>
    tpu.vector_store %arg8[%c0_16, %c0_17], %23 {strides = array<i32>} : memref<2x16xf32, #tpu.memory_space<vmem>>, vector<2x16xf32>,
    return
  }
  func.func @transform_0(%arg0: i32) -> (i32, i32) {
    %c0_i32 = arith.constant 0 : i32
    %c0_i32_0 = arith.constant 0 : i32
    %c0_i32_1 = arith.constant 0 : i32
    return %c0_i32, %c0_i32_0 : i32, i32
  }
  func.func @transform_1(%arg0: i32) -> (i32, i32) {
    %c0_i32 = arith.constant 0 : i32
    %c0_i32_0 = arith.constant 0 : i32
    %c0_i32_1 = arith.constant 0 : i32
    return %c0_i32, %c0_i32_0 : i32, i32
  }
  func.func @transform_2(%arg0: i32) -> (i32, i32) {
    %c0_i32 = arith.constant 0 : i32
    %c0_i32_0 = arith.constant 0 : i32
    %c0_i32_1 = arith.constant 0 : i32
    return %c0_i32, %c0_i32_0 : i32, i32
  }
  func.func @transform_3(%arg0: i32) -> (i32, i32) {
    %c0_i32 = arith.constant 0 : i32
    %c0_i32_0 = arith.constant 0 : i32
    %c0_i32_1 = arith.constant 0 : i32
    return %c0_i32, %c0_i32_0 : i32, i32
  }
  func.func @transform_4(%arg0: i32) -> (i32, i32) {
    %c0_i32 = arith.constant 0 : i32
    %c0_i32_0 = arith.constant 0 : i32
    %c0_i32_1 = arith.constant 0 : i32
    return %c0_i32, %c0_i32_0 : i32, i32
  }
  func.func @transform_5(%arg0: i32) -> (i32, i32) {
    %c0_i32 = arith.constant 0 : i32
    %c0_i32_0 = arith.constant 0 : i32
    %c0_i32_1 = arith.constant 0 : i32
    return %c0_i32, %c0_i32_0 : i32, i32
  }
  func.func @transform_6(%arg0: i32) -> (i32, i32) {
    %c0_i32 = arith.constant 0 : i32
    %c0_i32_0 = arith.constant 0 : i32
    %c0_i32_1 = arith.constant 0 : i32
    return %c0_i32, %c0_i32_0 : i32, i32
  }
  func.func @transform_7(%arg0: i32) -> (i32, i32) {
    %c0_i32 = arith.constant 0 : i32
    %c0_i32_0 = arith.constant 0 : i32
    %c0_i32_1 = arith.constant 0 : i32
    return %c0_i32, %c0_i32_0 : i32, i32
  }
}

</mosaic_0001>

<bundles_post_ra>
// kernel: mlp_dropout_forward.1
= control target key start
LH: loop header
LB: loop body
LE: loop exit
PB: predicated region body
PF: predicated region fallthrough
CT: control target
= control target key end

     0   :  { %v164_v28 = vlaneseq  ;;  %v1137_v36 = vmov 1966171168   ;;  %s1410_s0 = inlined_call_operand.vmem [shape: bf16[2,1024], index: 0, kind: input, shape index: {}]   ;;  %s1411_s1 = inlined_call_operand.vmem [shape: bf16[1024,32], index: 1, kind: input, shape index: {}]   ;;  %s1412_s2 = inlined_call_operand.vmem [shape: f32[1,32], index: 2, kind: input, shape index: {}]   ;;  %s1413_s3 = inlined_call_operand.vmem [shape: f32[1,32], index: 3, kind: input, shape index: {}]   ;;  %s1414_s4 = inlined_call_operand.vmem [shape: bf16[32,16], index: 4, kind: input, shape index: {}]   ;;  %s1415_s5 = inlined_call_operand.vmem [shape: f32[1,16], index: 5, kind: input, shape index: {}]   ;;  %s1416_s6 = inlined_call_operand.vmem [shape: f32[1,16], index: 6, kind: input, shape index: {}]   ;;  %s1417_s7 = inlined_call_operand.hbm [shape: f32[2,16], index: 7, kind: output, shape index: {}]  }
   0x1   :  { %v1046_v0 = vld [vmem:[%s1411_s1 + $0x78] sm:$0xff]   ;;  %v1050_v4 = vld [vmem:[%s1411_s1 + $0x70] sm:$0xff]   ;;  %v1054_v8 = vld [vmem:[%s1411_s1 + $0x68] sm:$0xff]   ;;  %v162_v37 = vunpack.c.l.s4 %v1137_v36 }
   0x2   :  { %v1047_v1 = vld [vmem:[%s1411_s1 + $0xf8] sm:$0xff]   ;;  %943 = vmatprep.subr.bf16.mxu0 %v1046_v0  ;;  %v1051_v5 = vld [vmem:[%s1411_s1 + $0xf0] sm:$0xff]   ;;  %v1055_v9 = vld [vmem:[%s1411_s1 + $0xe8] sm:$0xff]   ;;  %v165_v33 = vshrl.u32 %v164_v28, 7 }
   0x3   :  { %v1048_v2 = vld [vmem:[%s1411_s1 + $0x38] sm:$0xff]   ;;  %965 = vmatprep.subr.bf16.mxu1 %v1047_v1  ;;  %v1052_v6 = vld [vmem:[%s1411_s1 + $0x30] sm:$0xff]   ;;  %v1056_v10 = vld [vmem:[%s1411_s1 + $0x28] sm:$0xff]   ;;  %v163_v40 = vunpack.c.0.s8 %v162_v37 }
   0x4   :  { %v1049_v3 = vld [vmem:[%s1411_s1 + $0xb8] sm:$0xff]   ;;  %944 = vmatpush3.bf16.msra.mxu0 %v1048_v2  ;;  %v1053_v7 = vld [vmem:[%s1411_s1 + $0xb0] sm:$0xff]   ;;  %v1057_v11 = vld [vmem:[%s1411_s1 + $0xa8] sm:$0xff]  }
   0x5   :  { %966 = vmatpush3.bf16.msra.mxu1 %v1049_v3  ;;  %945 = vmatprep.subr.bf16.mxu0 %v1050_v4  ;;  %v1058_v12 = vld [vmem:[%s1411_s1 + $0x60] sm:$0xff]   ;;  %v1062_v16 = vld [vmem:[%s1411_s1 + $0x58] sm:$0xff]   ;;  %v1066_v20 = vld [vmem:[%s1411_s1 + $0x50] sm:$0xff]   ;;  %v1286_v41 = vsub.s32 %v163_v40, %v165_v33 }
   0x6   :  { %967 = vmatprep.subr.bf16.mxu1 %v1051_v5  ;;  %v1059_v13 = vld [vmem:[%s1411_s1 + $0xe0] sm:$0xff]   ;;  %v1063_v17 = vld [vmem:[%s1411_s1 + $0xd8] sm:$0xff]   ;;  %v1067_v21 = vld [vmem:[%s1411_s1 + $0xd0] sm:$0xff]  }
   0x7   :  { %v1060_v14 = vld [vmem:[%s1411_s1 + $0x20] sm:$0xff]   ;;  %v1064_v18 = vld [vmem:[%s1411_s1 + $0x18] sm:$0xff]   ;;  %v1068_v22 = vld [vmem:[%s1411_s1 + $0x10] sm:$0xff]  }
   0x8   :  { %946 = vmatpush3.bf16.msra.mxu0 %v1052_v6  ;;  %v1061_v15 = vld [vmem:[%s1411_s1 + $0xa0] sm:$0xff]   ;;  %v1065_v19 = vld [vmem:[%s1411_s1 + $0x98] sm:$0xff]   ;;  %v1069_v23 = vld [vmem:[%s1411_s1 + $0x90] sm:$0xff]  }
   0x9   :  { %968 = vmatpush3.bf16.msra.mxu1 %v1053_v7  ;;  %947 = vmatprep.subr.bf16.mxu0 %v1054_v8  ;;  %v1070_v24 = vld [vmem:[%s1411_s1 + $0x48] sm:$0xff]   ;;  %v1074_v29 = vld [vmem:[%s1411_s1 + $0x40] sm:$0xff]   ;;  %v1079_v35 = vld [vmem:[%s1411_s1 + $0x178] sm:$0xff]  }
   0xa   :  { %969 = vmatprep.subr.bf16.mxu1 %v1055_v9  ;;  %v1071_v25 = vld [vmem:[%s1411_s1 + $0xc8] sm:$0xff]   ;;  %v1075_v30 = vld [vmem:[%s1411_s1 + $0xc0] sm:$0xff]   ;;  %v1080_v38 = vld [vmem:[%s1411_s1 + $0x1f8] sm:$0xff]  }
   0xb   :  { %v1072_v26 = vld [vmem:[%s1411_s1 + $0x8] sm:$0xff]   ;;  %v1076_v31 = vld [vmem:[%s1411_s1] sm:$0xff]   ;;  %v1081_v47 = vld [vmem:[%s1411_s1 + $0x138] sm:$0xff]  }
   0xc   :  { %948 = vmatpush3.bf16.msra.mxu0 %v1056_v10  ;;  %v1073_v27 = vld [vmem:[%s1411_s1 + $0x88] sm:$0xff]   ;;  %v1077_v32 = vld [vmem:[%s1411_s1 + $0x80] sm:$0xff]   ;;  %v1082_v49 = vld [vmem:[%s1411_s1 + $0x1b8] sm:$0xff]  }
   0xd   :  { %970 = vmatpush3.bf16.msra.mxu1 %v1057_v11  ;;  %949 = vmatprep.subr.bf16.mxu0 %v1058_v12  ;;  %v28_v34 = vld [vmem:[%s1410_s0] sm:$0xff]  ;;  %v1083_v52 = vld [vmem:[%s1411_s1 + $0x170] sm:$0xff]   ;;  %v1087_v58 = vld [vmem:[%s1411_s1 + $0x168] sm:$0xff]  }
   0xe   :  { %971 = vmatprep.subr.bf16.mxu1 %v1059_v13  ;;  %v160_v39 = vcombine.high %v28_v34, %v28_v34  ;;  %v167_v42 = vrot.slane %v28_v34, %v1286_v41  ;;  %v1084_v54 = vld [vmem:[%s1411_s1 + $0x1f0] sm:$0xff]   ;;  %v1088_v59 = vld [vmem:[%s1411_s1 + $0x1e8] sm:$0xff]   ;;  %v1091_v62 = vld [vmem:[%s1411_s1 + $0x160] sm:$0xff]  }
   0xf   :  { %v1085_v55 = vld [vmem:[%s1411_s1 + $0x130] sm:$0xff]   ;;  %v1089_v60 = vld [vmem:[%s1411_s1 + $0x128] sm:$0xff]   ;;  %v1092_v63 = vld [vmem:[%s1411_s1 + $0x1e0] sm:$0xff]  }
  0x10   :  { %950 = vmatpush3.bf16.msra.mxu0 %v1060_v14  ;;  %v1290_v43 = vrot.slane %v160_v39, %v1286_v41  ;;  %v175_v44 = vcombine.high %v167_v42, %v167_v42  ;;  %v183_v45 = vrot.slane %v167_v42, %v1286_v41  ;;  %v1086_v57 = vld [vmem:[%s1411_s1 + $0x1b0] sm:$0xff]   ;;  %v1090_v61 = vld [vmem:[%s1411_s1 + $0x1a8] sm:$0xff]   ;;  %v1093_v0 = vld [vmem:[%s1411_s1 + $0x120] sm:$0xff]  }
  0x11   :  { %972 = vmatpush3.bf16.msra.mxu1 %v1061_v15  ;;  %951 = vmatprep.subr.bf16.mxu0 %v1062_v16  ;;  %v1094_v1 = vld [vmem:[%s1411_s1 + $0x1a0] sm:$0xff]   ;;  %v1095_v2 = vld [vmem:[%s1411_s1 + $0x158] sm:$0xff]   ;;  %v1099_v6 = vld [vmem:[%s1411_s1 + $0x150] sm:$0xff]  }
  0x12   :  { %973 = vmatprep.subr.bf16.mxu1 %v1063_v17  ;;  %v176_v46 = vcombine.high %v1290_v43, %v1290_v43  ;;  %v197_v48 = vrot.slane %v175_v44, %v1286_v41  ;;  %v205_v51 = vcombine.high %v183_v45, %v183_v45  ;;  %v1096_v3 = vld [vmem:[%s1411_s1 + $0x1d8] sm:$0xff]   ;;  %v1100_v7 = vld [vmem:[%s1411_s1 + $0x1d0] sm:$0xff]   ;;  %v1103_v10 = vld [vmem:[%s1411_s1 + $0x148] sm:$0xff]  }
  0x13   :  { %v1097_v4 = vld [vmem:[%s1411_s1 + $0x118] sm:$0xff]   ;;  %v1101_v8 = vld [vmem:[%s1411_s1 + $0x110] sm:$0xff]  }
  0x14   :  { %952 = vmatpush3.bf16.msra.mxu0 %v1064_v18  ;;  %v204_v50 = vrot.slane %v176_v46, %v1286_v41  ;;  %633 = vmatprep.mubr.bf16.mxu0 %v197_v48  ;;  %v207_v53 = vcombine.high %v197_v48, %v197_v48  ;;  %v1098_v5 = vld [vmem:[%s1411_s1 + $0x198] sm:$0xff]   ;;  %v1102_v9 = vld [vmem:[%s1411_s1 + $0x190] sm:$0xff]  }
  0x15   :  { %974 = vmatpush3.bf16.msra.mxu1 %v1065_v19  ;;  %953 = vmatprep.subr.bf16.mxu0 %v1066_v20 }
  0x16   :  { %975 = vmatprep.subr.bf16.mxu1 %v1067_v21  ;;  %v208_v56 = vcombine.high %v204_v50, %v204_v50  ;;  %673 = vmatprep.mubr.bf16.mxu1 %v207_v53 }
  0x18   :  { %954 = vmatpush3.bf16.msra.mxu0 %v1068_v22 }
  0x19   :  { %976 = vmatpush3.bf16.msra.mxu1 %v1069_v23  ;;  %955 = vmatprep.subr.bf16.mxu0 %v1070_v24 }
  0x1a   :  { %977 = vmatprep.subr.bf16.mxu1 %v1071_v25 }
  0x1c   :  { %956 = vmatpush3.bf16.msra.mxu0 %v1072_v26 }
  0x1d   :  { %978 = vmatpush3.bf16.msra.mxu1 %v1073_v27  ;;  %957 = vmatprep.subr.bf16.mxu0 %v1074_v29 }
  0x1e   :  { %979 = vmatprep.subr.bf16.mxu1 %v1075_v30 }
  0x20   :  { %958 = vmatpush3.bf16.msra.mxu0 %v1076_v31 }
  0x21   :  { %980 = vmatpush3.bf16.msra.mxu1 %v1077_v32  ;;  %987 = vmatprep.subr.bf16.mxu0 %v1079_v35 }
  0x22   :  { %1009 = vmatprep.subr.bf16.mxu1 %v1080_v38 }
  0x23   :  { %634 = vmatmul.mubr.bf16.vlgmr.msra.gmra.mxu0 %v183_v45 }
  0x24   :  { %988 = vmatpush3.bf16.msra.mxu0 %v1081_v47  ;;  %674 = vmatmul.mubr.bf16.vlgmr.msra.gmra.mxu1 %v205_v51 }
  0x25   :  { %989 = vmatprep.subr.bf16.mxu0 %v1083_v52  ;;  %1010 = vmatpush3.bf16.msra.mxu1 %v1082_v49 }
  0x26   :  { %713 = vmatprep.mubr.bf16.mxu0 %v204_v50  ;;  %1011 = vmatprep.subr.bf16.mxu1 %v1084_v54 }
  0x27   :  { %753 = vmatprep.mubr.bf16.mxu1 %v208_v56 }
  0x28   :  { %990 = vmatpush3.bf16.msra.mxu0 %v1085_v55 }
  0x29   :  { %991 = vmatprep.subr.bf16.mxu0 %v1087_v58  ;;  %1012 = vmatpush3.bf16.msra.mxu1 %v1086_v57 }
  0x2a   :  { %1013 = vmatprep.subr.bf16.mxu1 %v1088_v59 }
  0x2c   :  { %992 = vmatpush3.bf16.msra.mxu0 %v1089_v60 }
  0x2d   :  { %993 = vmatprep.subr.bf16.mxu0 %v1091_v62  ;;  %1014 = vmatpush3.bf16.msra.mxu1 %v1090_v61 }
  0x2e   :  { %1015 = vmatprep.subr.bf16.mxu1 %v1092_v63 }
  0x30   :  { %994 = vmatpush3.bf16.msra.mxu0 %v1093_v0 }
  0x31   :  { %995 = vmatprep.subr.bf16.mxu0 %v1095_v2  ;;  %1016 = vmatpush3.bf16.msra.mxu1 %v1094_v1 }
  0x32   :  { %1017 = vmatprep.subr.bf16.mxu1 %v1096_v3 }
  0x34   :  { %996 = vmatpush3.bf16.msra.mxu0 %v1097_v4 }
  0x35   :  { %997 = vmatprep.subr.bf16.mxu0 %v1099_v6  ;;  %1018 = vmatpush3.bf16.msra.mxu1 %v1098_v5 }
  0x36   :  { %12 = vsyncpa [#allocation3], 0  ;;  %1019 = vmatprep.subr.bf16.mxu1 %v1100_v7  ;;  %v1104_v11 = vld [vmem:[%s1411_s1 + $0x1c8] sm:$0xff]   ;;  %v1107_v13 = vld [vmem:[%s1411_s1 + $0x140] sm:$0xff]   ;;  %v190_v17 = vrot.slane %v1290_v43, %v1286_v41  ;;  %v1138_v21 = vmov 0.0   ;;  %vm1139_vm0 = vmmov 0  }
  0x37   :  { %v1105_v12 = vld [vmem:[%s1411_s1 + $0x108] sm:$0xff]   ;;  %v1108_v15 = vld [vmem:[%s1411_s1 + $0x1c0] sm:$0xff]   ;;  %vm797_vm2 = vcmask 261120   ;;  %vm856_vm3 = vcmask 123904  }
  0x38   :  { %998 = vmatpush3.bf16.msra.mxu0 %v1101_v8  ;;  %v1106_v14 = vld [vmem:[%s1411_s1 + $0x188] sm:$0xff]   ;;  %v1109_v16 = vld [vmem:[%s1411_s1 + $0x100] sm:$0xff]   ;;  %v206_v19 = vcombine.high %v190_v17, %v190_v17 }
  0x39   :  { %999 = vmatprep.subr.bf16.mxu0 %v1103_v10  ;;  %1020 = vmatpush3.bf16.msra.mxu1 %v1102_v9  ;;  %v1110_v18 = vld [vmem:[%s1411_s1 + $0x180] sm:$0xff]   ;;  %v1111_v20 = vld [vmem:[%s1414_s4 + $0x8] sm:$0xff]  }
  0x3a   :  { %1021 = vmatprep.subr.bf16.mxu1 %v1104_v11  ;;  %v1112_v22 = vld [vmem:[%s1414_s4] sm:$0xff]  }
  0x3b   :  { %v936_v42 = vld [vmem:[%s1412_s2] ss:$0 sm:$0xff] }
  0x3c   :  { %1000 = vmatpush3.bf16.msra.mxu0 %v1105_v12  ;;  %v937_v46 = vld [vmem:[%s1413_s3] ss:$0 sm:$0xff]  ;;  %s1140_s3 = smov [#allocation2]  }
  0x3d   :  { %1001 = vmatprep.subr.bf16.mxu0 %v1107_v13  ;;  %1022 = vmatpush3.bf16.msra.mxu1 %v1106_v14  ;;  %v941_v53 = vld [vmem:[%s1415_s5] ss:$0 sm:$0xff]  ;;  %s864_s22 = sshll.u32 %s1140_s3, 4  ;;  %s865_s22 = int_to_ptr.vmem [resolvable:$true] %s864_s22 }
  0x3e   :  { %1023 = vmatprep.subr.bf16.mxu1 %v1108_v15  ;;  %v942_v54 = vld [vmem:[%s1416_s6] ss:$0 sm:$0xff]  ;;  %s1115_s23 = scalar_lea.vmem %s865_s22, 32  ;;  %p1120_p1 = scmp.lt.s32.totalorder %s865_s22, %s865_s22 }
  0x3f   :  { %p1116_p0 = scmp.ne.s32.totalorder %s865_s22, %s1115_s23  ;;  %p1121_p2 = scmp.lt.s32.totalorder %s1115_s23, %s1115_s23 }
  0x40   :  { %1002 = vmatpush3.bf16.msra.mxu0 %v1109_v16 }
  0x41   :  { %1024 = vmatpush3.bf16.msra.mxu1 %v1110_v18  ;;  %1034 = vmatprep.subr.bf16.mxu0 %v1138_v21  ;;  %p1122_p3 = por %p1121_p2, %p1120_p1 }
  0x43   :  { %714 = vmatmul.mubr.bf16.vlgmr.msra.gmra.mxu0 %v190_v17  ;;  %p1123_p4 = pnand %p1122_p3, %p1116_p0 }
  0x44   :  { %754 = vmatmul.mubr.bf16.vlgmr.msra.gmra.mxu1 %v206_v19  ;;  %1035 = vmatpush3.bf16.msra.mxu0 %v1111_v20 }
  0x45   :  { %1036 = vmatprep.subr.bf16.mxu0 %v1138_v21  ;;  %1038 = vmatprep.mubr.msk.bf16.mxu0 %vm1139_vm0, %v1138_v21 }
  0x48   :  { %1037 = vmatpush3.bf16.msra.mxu0 %v1112_v22 }
  0xe3   :  { %v959_v23 = vpop.f32.mrf.mxu0 }
  0xe4   :  { %v981_v24 = vpop.f32.mrf.mxu1 }
  0xe5   :  { %v960_v25 = vpop.f32.mrf.mxu0 }
  0xe6   :  { %v982_v26 = vpop.f32.mrf.mxu1  ;;  %v961_v31 = vadd.f32 %v960_v25, %v959_v23 }
  0xe7   :  { %v962_v27 = vpop.f32.mrf.mxu0  ;;  %v983_v32 = vadd.f32 %v982_v26, %v981_v24 }
  0xe8   :  { %v984_v28 = vpop.f32.mrf.mxu1 }
  0xe9   :  { %v963_v29 = vpop.f32.mrf.mxu0  ;;  %v676_v36 = vadd.f32 %v983_v32, %v961_v31 }
  0xea   :  { %v985_v30 = vpop.f32.mrf.mxu1 }
 0x103   :  { %v1003_v33 = vpop.f32.mrf.mxu0 }
 0x104   :  { %v1025_v34 = vpop.f32.mrf.mxu1 }
 0x105   :  { %v1004_v35 = vpop.f32.mrf.mxu0 }
 0x106   :  { %v1005_v37 = vadd.f32 %v1004_v35, %v1003_v33  ;;  %v1026_v38 = vpop.f32.mrf.mxu1 }
 0x107   :  { %v1006_v39 = vpop.f32.mrf.mxu0  ;;  %v1027_v41 = vadd.f32 %v1026_v38, %v1025_v34 }
 0x108   :  { %v716_v40 = vadd.f32 %v1005_v37, %v676_v36  ;;  %v1028_v43 = vpop.f32.mrf.mxu1 }
 0x109   :  { %v1007_v44 = vpop.f32.mrf.mxu0 }
 0x10a   :  { %v756_v45 = vadd.f32 %v1027_v41, %v716_v40  ;;  %v1029_v47 = vpop.f32.mrf.mxu1 }
 0x10c   :  { %v767_v48 = vmul.f32 %v936_v42, %v756_v45 }
 0x10e   :  { %v774_v49 = vadd.f32 %v937_v46, %v767_v48 }
 0x110   :  { %vm775_vm1 = vcmp.ge.f32.partialorder %v774_v49, 0.0  ;;  %v776_v50 = vmul.f32 0.25, %v774_v49 }
 0x112   :  { %v777_v51 = vsel %vm775_vm1, %v774_v49, %v776_v50 }
 0x113   :  { %v778_v52 = vpack.c.bf16 %v777_v51, %v777_v51 }
 0x115   :  { %1039 = vmatmul.mubr.msk.bf16.vlgmr.msra.gmra.mxu0 %vm797_vm2, %v778_v52 }
 0x1d5   :  { %v835_v55 = vpop.f32.mrf.mxu0 }
 0x1d6   :  { %v847_v56 = vmul.f32 %v941_v53, %v835_v55 }
 0x1d7   :  { %v1040_v57 = vpop.f32.mrf.mxu0 }
 0x1d8   :  { %v854_v58 = vadd.f32 %v942_v54, %v847_v56 }
 0x1d9   :  { %v838_v59 = vpop.f32.mrf.mxu0 }
 0x1da   :  { %1113 = vtanh.f32 %v854_v58 }
 0x1db   :  { %v1041_v60 = vpop.f32.mrf.mxu0 }
 0x1e7   :  { %v1114_v61 = vpop.eup %1113 }
 0x1e8   :  { %857 = vst.msk [vmem:[#allocation2] sm:$0x3] %vm856_vm3, %v1114_v61 }
 0x1e9   :  { %1126 = shalt.err (!%p1123_p4)
}
 0x1ea   :  { %867 = dma.vmem_to_hbm [thread:$0]  %s865_s22, 32, %s1417_s7, [#allocation3]  }
 0x1eb   :  { %1135 = dma.done.wait [#allocation3], 32  }
 0x1ec   :  { %1136 = vsyncadd [#allocation3], 4294967264 }
 0x1ed   :  { %871 = vsyncpa [#allocation3], 1 }

</bundles_post_ra>
